<compile_context>
chip_gen: v6e
topology: v6e:2x2x1
jax: 0.10.0
libtpu: 0.0.40
codegen_flags: <defaults>
</compile_context>

<pallas_src>
import numpy as np
import jax
import jax.numpy as jnp
from jax.experimental import pallas as pl
from jax.experimental.pallas import tpu as pltpu


# ----------------------------------------------------------------------------
# Host-side helpers: bicubic interpolation matrices (plain numpy, done once).
# ----------------------------------------------------------------------------
def _cubic_weight(x, A=-0.75):
    x = abs(float(x))
    if x <= 1.0:
        return ((A + 2.0) * x - (A + 3.0)) * x * x + 1.0
    elif x < 2.0:
        return ((A * x - 5.0 * A) * x + 8.0 * A) * x - 4.0 * A
    return 0.0


def _bicubic_matrix(in_size, out_size):
    """Rows = output pixels, cols = input pixels (align_corners=False)."""
    scale = in_size / out_size
    mat = np.zeros((out_size, in_size), dtype=np.float64)
    for i in range(out_size):
        real = (i + 0.5) * scale - 0.5
        i0 = int(np.floor(real))
        t = real - i0
        for k, off in zip((i0 - 1, i0, i0 + 1, i0 + 2),
                          (t + 1.0, t, 1.0 - t, 2.0 - t)):
            kc = min(max(k, 0), in_size - 1)       # border replication
            mat[i, kc] += _cubic_weight(off)
    return mat.astype(np.float32)


def _resize_output_size(h, w, size):
    """torchvision Resize([size]): shorter side -> size, keep aspect ratio."""
    short, long = (h, w) if h <= w else (w, h)
    new_short, new_long = size, int(size * long / short)
    return (new_short, new_long) if h <= w else (new_long, new_short)


def _crop_matrices(H, W, S):
    new_h, new_w = _resize_output_size(H, W, S)
    wh_full = _bicubic_matrix(H, new_h)                 # (new_h, H)
    ww_full = _bicubic_matrix(W, new_w)                 # (new_w, W)
    top = int(round((new_h - S) / 2.0))                 # CenterCrop folded in
    left = int(round((new_w - S) / 2.0))
    wh = wh_full[top:top + S]                           # (S, H)
    wwt = np.ascontiguousarray(ww_full[left:left + S].T)  # (W, S)
    return wh, wwt


def _split_bf16(m_np):
    """f32 matrix -> (hi, lo) bf16 pair with hi + lo ~= m to ~2^-17 relative."""
    m = jnp.asarray(np.asarray(m_np, np.float32))
    hi = m.astype(jnp.bfloat16)
    lo = (m - hi.astype(jnp.float32)).astype(jnp.bfloat16)
    return hi, lo


# ----------------------------------------------------------------------------
# Pallas kernel: one block of B image planes per grid step, native layouts.
# ----------------------------------------------------------------------------
def _make_transform_kernel(B, C):
    def kernel(x_ref, wh_hi_ref, wh_lo_ref, ww_hi_ref, ww_lo_ref,
               inv_ref, bias_ref, o_ref):
        g = pl.program_id(0)
        # Resident interpolation matrices (constant index_map -> no re-DMA).
        wh_hi = wh_hi_ref[...]          # (S, H) bf16
        wh_lo = wh_lo_ref[...]
        ww_hi = ww_hi_ref[...]          # (W, S) bf16
        ww_lo = ww_lo_ref[...]

        def plane(b, carry):
            # int8 value = (u8 - 128); exact in bf16 (|v| <= 128 < 2^8).
            img = x_ref[b].astype(jnp.float32).astype(jnp.bfloat16)     # (H, W)
            # H-contraction: split-bf16 weights -> 2 bf16 MXU passes, f32 acc.
            t = (jnp.dot(wh_hi, img, preferred_element_type=jnp.float32)
                 + jnp.dot(wh_lo, img, preferred_element_type=jnp.float32))  # (S, W) f32
            # W-contraction: split t and Ww^T (drop the lo*lo term) -> 3 passes.
            t_hi = t.astype(jnp.bfloat16)
            t_lo = (t - t_hi.astype(jnp.float32)).astype(jnp.bfloat16)
            r = (jnp.dot(t_hi, ww_hi, preferred_element_type=jnp.float32)
                 + jnp.dot(t_hi, ww_lo, preferred_element_type=jnp.float32)
                 + jnp.dot(t_lo, ww_hi, preferred_element_type=jnp.float32))  # (S, S) f32
            # torchvision re-quantizes the uint8 tensor after Resize; the image
            # is offset by -128, so clamp to [-128, 127] and fold the +128 into
            # the normalize bias below.
            q = jnp.clip(jnp.round(r), -128.0, 127.0)
            # Per-channel normalize: out = q * inv + bias (scalar FMA).
            c = (g * B + b) % C
            o_ref[b] = (q * inv_ref[c] + bias_ref[c]).astype(o_ref.dtype)
            return carry

        jax.lax.fori_loop(0, B, plane, 0, unroll=True)

    return kernel


def transform_forward(x_u8, image_size, mean, std, *, out_dtype=jnp.float32):
    """x_u8: uint8 NCHW image batch.  Returns (N, C, S, S) in out_dtype."""
    N, C, H, W = x_u8.shape
    S = int(image_size)
    P = N * C

    wh_np, wwt_np = _crop_matrices(H, W, S)             # (S, H), (W, S)
    wh_hi, wh_lo = _split_bf16(wh_np)
    ww_hi, ww_lo = _split_bf16(wwt_np)

    # Planes per grid step: ~2 MiB of input per step (amortizes the ~600-cycle
    # per-step overhead, gives big DMAs), capped to keep the unrolled loop and
    # the double-buffered VMEM footprint modest, and clamped so G >= 2 (v7x has
    # 2 TensorCores on the "parallel" axis).
    target_bytes = 2 << 20
    B = max(1, min(16, -(-target_bytes // (H * W))))
    if P >= 2:
        B = min(B, -(-P // 2))
    B = max(1, min(B, P))
    G = -(-P // B)
    P_pad = G * B
    # Per-step VMEM ~ 2*B*H*W (int8, dbl-buffered) + 2*4*B*S*S (out) + weights;
    # far below the 32 MiB scoped default on all of v5e/v6e/v7x for these caps.

    # u8 -> (u8 ^ 0x80) bitcast int8  ==>  signed value (u8 - 128); one fused
    # elementwise pass, keeps input DMA at 1 byte/pixel and lets the kernel use
    # a single signed 8-bit convert (no int32 `& 0xFF` unpack).
    xs = jax.lax.bitcast_convert_type(
        jnp.bitwise_xor(x_u8, jnp.uint8(0x80)), jnp.int8).reshape(P, H, W)
    if P_pad != P:
        xs = jnp.concatenate(
            [xs, jnp.zeros((P_pad - P, H, W), dtype=jnp.int8)], axis=0)

    # Per-channel coefficients (tiny, resident in SMEM, grid-invariant):
    #   out = q * inv + bias,  q = round(resize) - 128,
    #   inv  = 1/(255*std_c),  bias = 128/(255*std_c) - mean_c/std_c.
    mean64 = np.asarray(mean, np.float64)
    std64 = np.asarray(std, np.float64)
    inv_c = (1.0 / (255.0 * std64)).astype(np.float32)
    bias_c = (128.0 / (255.0 * std64) - mean64 / std64).astype(np.float32)

    out = pl.pallas_call(
        _make_transform_kernel(B, C),
        out_shape=jax.ShapeDtypeStruct((P_pad, S, S), out_dtype),
        grid=(G,),
        in_specs=[
            pl.BlockSpec((B, H, W), lambda g: (g, 0, 0)),        # image planes (i8)
            pl.BlockSpec((S, H), lambda g: (0, 0)),              # Wh hi  (resident)
            pl.BlockSpec((S, H), lambda g: (0, 0)),              # Wh lo  (resident)
            pl.BlockSpec((W, S), lambda g: (0, 0)),              # Ww^T hi (resident)
            pl.BlockSpec((W, S), lambda g: (0, 0)),              # Ww^T lo (resident)
            pl.BlockSpec(memory_space=pltpu.MemorySpace.SMEM),   # inv  (C,)
            pl.BlockSpec(memory_space=pltpu.MemorySpace.SMEM),   # bias (C,)
        ],
        out_specs=pl.BlockSpec((B, S, S), lambda g: (g, 0, 0)),  # native layout
        compiler_params=pltpu.CompilerParams(
            dimension_semantics=("parallel",)),
    )(xs, wh_hi, wh_lo, ww_hi, ww_lo,
      jnp.asarray(inv_c), jnp.asarray(bias_c))

    return out[:P].reshape(N, C, S, S)


# ----------------------------------------------------------------------------
# High-precision reference (float64 numpy, same interpolation matrices).
# ----------------------------------------------------------------------------
def _reference(x_u8_np, image_size, mean, std):
    N, C, H, W = x_u8_np.shape
    S = int(image_size)
    wh_np, wwt_np = _crop_matrices(H, W, S)
    x = x_u8_np.reshape(N * C, H, W).astype(np.float64)
    r_pre = np.einsum('sh,phw,wt->pst',
                      wh_np.astype(np.float64), x, wwt_np.astype(np.float64))
    q = np.clip(np.round(r_pre), 0.0, 255.0) / 255.0     # np.round = half-even
    q = q.reshape(N, C, S, S)
    m = np.asarray(mean, np.float64)[None, :, None, None]
    s = np.asarray(std, np.float64)[None, :, None, None]
    return (q - m) / s, r_pre.reshape(N, C, S, S)


if __name__ == "__main__":
    image_size = 16
    mean = [0.48145466, 0.4578275, 0.40821073]   # CLIP image mean
    std = [0.26862954, 0.26130258, 0.27577711]   # CLIP image std

    key = jax.random.PRNGKey(0)
    x = jax.random.randint(key, (2, 3, 24, 20), 0, 256,
                           dtype=jnp.int32).astype(jnp.uint8)

    out = transform_forward(x, image_size, mean, std)
    out = jax.block_until_ready(out)
    assert out.shape == (2, 3, image_size, image_size)
    assert out.dtype == jnp.float32

    ref, r_pre = _reference(np.asarray(x), image_size, mean, std)
    out_np = np.asarray(out, np.float64)
    err = np.abs(out_np - ref)
    strict = err <= 1e-5 * (1.0 + np.abs(ref))
    # The split-bf16 matmul path reproduces the f32 resize values to ~5e-3, so
    # only pixels whose pre-round value sits that close to a .5 boundary can
    # quantize one uint8 LSB apart from the exact reference; excuse those.
    frac = r_pre - np.floor(r_pre)
    near_half = np.abs(frac - 0.5) < 2e-2
    lsb = (1.0 / (255.0 * np.asarray(std, np.float64)))[None, :, None, None]
    boundary_ok = near_half & (err <= lsb * 1.001 + 1e-5)
    assert np.all(strict | boundary_ok), float(err.max())

    print("KERNEL_OK")
</pallas_src>

<mosaic_0001>
module attributes {stable_mosaic.version = 11 : i64} {
  func.func @kernel(%arg0: i32, %arg1: memref<3x24x20xi8, #tpu.memory_space<vmem>>, %arg2: memref<16x24xbf16, #tpu.memory_space<vmem>>, %arg3: memref<16x24xbf16, #tpu.memory_space<vmem>>, %arg4: memref<20x16xbf16, #tpu.memory_space<vmem>>, %arg5: memref<20x16xbf16, #tpu.memory_space<vmem>>, %arg6: memref<3xf32, #tpu.memory_space<smem>>, %arg7: memref<3xf32, #tpu.memory_space<smem>>, %arg8: memref<3x16x16xf32, #tpu.memory_space<vmem>>) attributes {dimension_semantics = [#tpu.dimension_semantics<parallel>], iteration_bounds = array<i64: 2>, scalar_prefetch = 0 : i64, scratch_operands = 0 : i64, tpu.core_type = #tpu.core_type<tc>, window_params = [{transform_indices = @transform_0, window_bounds = array<i64: 3, 24, 20>}, {pipeline_mode = #tpu.pipeline_mode<synchronous>, transform_indices = @transform_1, window_bounds = array<i64: 16, 24>}, {pipeline_mode = #tpu.pipeline_mode<synchronous>, transform_indices = @transform_2, window_bounds = array<i64: 16, 24>}, {pipeline_mode = #tpu.pipeline_mode<synchronous>, transform_indices = @transform_3, window_bounds = array<i64: 20, 16>}, {pipeline_mode = #tpu.pipeline_mode<synchronous>, transform_indices = @transform_4, window_bounds = array<i64: 20, 16>}, {transform_indices = @transform_5, window_bounds = array<i64: 3>}, {transform_indices = @transform_6, window_bounds = array<i64: 3>}, {transform_indices = @transform_7, window_bounds = array<i64: 3, 16, 16>}]} {
    %c0 = arith.constant 0 : index
    %c0_0 = arith.constant 0 : index
    %0 = vector.load %arg2[%c0, %c0_0] : memref<16x24xbf16, #tpu.memory_space<vmem>>, vector<16x24xbf16>
    %c0_1 = arith.constant 0 : index
    %c0_2 = arith.constant 0 : index
    %1 = vector.load %arg3[%c0_1, %c0_2] : memref<16x24xbf16, #tpu.memory_space<vmem>>, vector<16x24xbf16>
    %c0_3 = arith.constant 0 : index
    %c0_4 = arith.constant 0 : index
    %2 = vector.load %arg4[%c0_3, %c0_4] : memref<20x16xbf16, #tpu.memory_space<vmem>>, vector<20x16xbf16>
    %c0_5 = arith.constant 0 : index
    %c0_6 = arith.constant 0 : index
    %3 = vector.load %arg5[%c0_5, %c0_6] : memref<20x16xbf16, #tpu.memory_space<vmem>>, vector<20x16xbf16>
    %c0_i32 = arith.constant 0 : i32
    %4 = arith.index_cast %c0_i32 : i32 to index
    %c0_7 = arith.constant 0 : index
    %c0_8 = arith.constant 0 : index
    %5 = vector.load %arg1[%4, %c0_7, %c0_8] : memref<3x24x20xi8, #tpu.memory_space<vmem>>, vector<1x24x20xi8>
    %6 = vector.shape_cast %5 : vector<1x24x20xi8> to vector<24x20xi8>
    %7 = arith.sitofp %6 : vector<24x20xi8> to vector<24x20xf32>
    %8 = arith.truncf %7 : vector<24x20xf32> to vector<24x20xbf16>
    %cst = arith.constant dense<0.000000e+00> : vector<16x20xf32>
    %9 = tpu.matmul %0, %8, %cst {dimension_numbers = #tpu.dot_dimension_numbers<[1], [0], [0], [1], [0, 0, 1, 1], [], []>} : vector<16x24xbf16>, vector<24x20xbf16>, vector<16x20xf32> -> vector<16x20xf32>
    %cst_9 = arith.constant dense<0.000000e+00> : vector<16x20xf32>
    %10 = tpu.matmul %1, %8, %cst_9 {dimension_numbers = #tpu.dot_dimension_numbers<[1], [0], [0], [1], [0, 0, 1, 1], [], []>} : vector<16x24xbf16>, vector<24x20xbf16>, vector<16x20xf32> -> vector<16x20xf32>
    %11 = arith.addf %9, %10 : vector<16x20xf32>
    %12 = arith.truncf %11 : vector<16x20xf32> to vector<16x20xbf16>
    %13 = arith.extf %12 : vector<16x20xbf16> to vector<16x20xf32>
    %14 = arith.subf %11, %13 : vector<16x20xf32>
    %15 = arith.truncf %14 : vector<16x20xf32> to vector<16x20xbf16>
    %cst_10 = arith.constant dense<0.000000e+00> : vector<16x16xf32>
    %16 = tpu.matmul %12, %2, %cst_10 {dimension_numbers = #tpu.dot_dimension_numbers<[1], [0], [0], [1], [0, 0, 1, 1], [], []>} : vector<16x20xbf16>, vector<20x16xbf16>, vector<16x16xf32> -> vector<16x16xf32>
    %cst_11 = arith.constant dense<0.000000e+00> : vector<16x16xf32>
    %17 = tpu.matmul %12, %3, %cst_11 {dimension_numbers = #tpu.dot_dimension_numbers<[1], [0], [0], [1], [0, 0, 1, 1], [], []>} : vector<16x20xbf16>, vector<20x16xbf16>, vector<16x16xf32> -> vector<16x16xf32>
    %18 = arith.addf %16, %17 : vector<16x16xf32>
    %cst_12 = arith.constant dense<0.000000e+00> : vector<16x16xf32>
    %19 = tpu.matmul %15, %2, %cst_12 {dimension_numbers = #tpu.dot_dimension_numbers<[1], [0], [0], [1], [0, 0, 1, 1], [], []>} : vector<16x20xbf16>, vector<20x16xbf16>, vector<16x16xf32> -> vector<16x16xf32>
    %20 = arith.addf %18, %19 : vector<16x16xf32>
    %21 = math.roundeven %20 : vector<16x16xf32>
    %cst_13 = arith.constant -1.280000e+02 : f32
    %cst_14 = arith.constant 1.270000e+02 : f32
    %22 = vector.broadcast %cst_13 : f32 to vector<16x16xf32>
    %23 = arith.maximumf %22, %21 : vector<16x16xf32>
    %24 = vector.broadcast %cst_14 : f32 to vector<16x16xf32>
    %25 = arith.minimumf %24, %23 : vector<16x16xf32>
    %c3_i32 = arith.constant 3 : i32
    %26 = arith.muli %arg0, %c3_i32 : i32
    %27 = arith.addi %26, %c0_i32 : i32
    %c3_i32_15 = arith.constant 3 : i32
    %c0_i32_16 = arith.constant 0 : i32
    %28 = arith.cmpi eq, %c3_i32_15, %c0_i32_16 : i32
    %c1_i32 = arith.constant 1 : i32
    %29 = arith.select %28, %c1_i32, %c3_i32_15 : i32
    %30 = arith.remsi %27, %29 : i32
    %c0_i32_17 = arith.constant 0 : i32
    %31 = arith.cmpi ne, %30, %c0_i32_17 : i32
    %c0_i32_18 = arith.constant 0 : i32
    %32 = arith.cmpi slt, %30, %c0_i32_18 : i32
    %c0_i32_19 = arith.constant 0 : i32
    %33 = arith.cmpi slt, %29, %c0_i32_19 : i32
    %34 = arith.xori %32, %33 : i1
    %35 = arith.andi %34, %31 : i1
    %36 = arith.addi %30, %29 : i32
    %37 = arith.select %35, %36, %30 : i32
    %38 = arith.index_cast %37 : i32 to index
    %39 = memref.load %arg6[%38] : memref<3xf32, #tpu.memory_space<smem>>
    %40 = vector.broadcast %39 : f32 to vector<16x16xf32>
    %41 = arith.mulf %25, %40 : vector<16x16xf32>
    %42 = arith.index_cast %37 : i32 to index
    %43 = memref.load %arg7[%42] : memref<3xf32, #tpu.memory_space<smem>>
    %44 = vector.broadcast %43 : f32 to vector<16x16xf32>
    %45 = arith.addf %41, %44 : vector<16x16xf32>
    %46 = arith.index_cast %c0_i32 : i32 to index
    %c0_20 = arith.constant 0 : index
    %c0_21 = arith.constant 0 : index
    %47 = vector.load %arg8[%46, %c0_20, %c0_21] : memref<3x16x16xf32, #tpu.memory_space<vmem>>, vector<1x16x16xf32>
    %48 = vector.shape_cast %47 : vector<1x16x16xf32> to vector<16x16xf32>
    %49 = vector.shape_cast %45 : vector<16x16xf32> to vector<1x16x16xf32>
    tpu.vector_store %arg8[%46, %c0_20, %c0_21], %49 {strides = array<i32>} : memref<3x16x16xf32, #tpu.memory_space<vmem>>, vector<1x16x16xf32>,
    %c1_i32_22 = arith.constant 1 : i32
    %50 = arith.index_cast %c1_i32_22 : i32 to index
    %c0_23 = arith.constant 0 : index
    %c0_24 = arith.constant 0 : index
    %51 = vector.load %arg1[%50, %c0_23, %c0_24] : memref<3x24x20xi8, #tpu.memory_space<vmem>>, vector<1x24x20xi8>
    %52 = vector.shape_cast %51 : vector<1x24x20xi8> to vector<24x20xi8>
    %53 = arith.sitofp %52 : vector<24x20xi8> to vector<24x20xf32>
    %54 = arith.truncf %53 : vector<24x20xf32> to vector<24x20xbf16>
    %cst_25 = arith.constant dense<0.000000e+00> : vector<16x20xf32>
    %55 = tpu.matmul %0, %54, %cst_25 {dimension_numbers = #tpu.dot_dimension_numbers<[1], [0], [0], [1], [0, 0, 1, 1], [], []>} : vector<16x24xbf16>, vector<24x20xbf16>, vector<16x20xf32> -> vector<16x20xf32>
    %cst_26 = arith.constant dense<0.000000e+00> : vector<16x20xf32>
    %56 = tpu.matmul %1, %54, %cst_26 {dimension_numbers = #tpu.dot_dimension_numbers<[1], [0], [0], [1], [0, 0, 1, 1], [], []>} : vector<16x24xbf16>, vector<24x20xbf16>, vector<16x20xf32> -> vector<16x20xf32>
    %57 = arith.addf %55, %56 : vector<16x20xf32>
    %58 = arith.truncf %57 : vector<16x20xf32> to vector<16x20xbf16>
    %59 = arith.extf %58 : vector<16x20xbf16> to vector<16x20xf32>
    %60 = arith.subf %57, %59 : vector<16x20xf32>
    %61 = arith.truncf %60 : vector<16x20xf32> to vector<16x20xbf16>
    %cst_27 = arith.constant dense<0.000000e+00> : vector<16x16xf32>
    %62 = tpu.matmul %58, %2, %cst_27 {dimension_numbers = #tpu.dot_dimension_numbers<[1], [0], [0], [1], [0, 0, 1, 1], [], []>} : vector<16x20xbf16>, vector<20x16xbf16>, vector<16x16xf32> -> vector<16x16xf32>
    %cst_28 = arith.constant dense<0.000000e+00> : vector<16x16xf32>
    %63 = tpu.matmul %58, %3, %cst_28 {dimension_numbers = #tpu.dot_dimension_numbers<[1], [0], [0], [1], [0, 0, 1, 1], [], []>} : vector<16x20xbf16>, vector<20x16xbf16>, vector<16x16xf32> -> vector<16x16xf32>
    %64 = arith.addf %62, %63 : vector<16x16xf32>
    %cst_29 = arith.constant dense<0.000000e+00> : vector<16x16xf32>
    %65 = tpu.matmul %61, %2, %cst_29 {dimension_numbers = #tpu.dot_dimension_numbers<[1], [0], [0], [1], [0, 0, 1, 1], [], []>} : vector<16x20xbf16>, vector<20x16xbf16>, vector<16x16xf32> -> vector<16x16xf32>
    %66 = arith.addf %64, %65 : vector<16x16xf32>
    %67 = math.roundeven %66 : vector<16x16xf32>
    %cst_30 = arith.constant -1.280000e+02 : f32
    %cst_31 = arith.constant 1.270000e+02 : f32
    %68 = vector.broadcast %cst_30 : f32 to vector<16x16xf32>
    %69 = arith.maximumf %68, %67 : vector<16x16xf32>
    %70 = vector.broadcast %cst_31 : f32 to vector<16x16xf32>
    %71 = arith.minimumf %70, %69 : vector<16x16xf32>
    %c3_i32_32 = arith.constant 3 : i32
    %72 = arith.muli %arg0, %c3_i32_32 : i32
    %73 = arith.addi %72, %c1_i32_22 : i32
    %c3_i32_33 = arith.constant 3 : i32
    %c0_i32_34 = arith.constant 0 : i32
    %74 = arith.cmpi eq, %c3_i32_33, %c0_i32_34 : i32
    %c1_i32_35 = arith.constant 1 : i32
    %75 = arith.select %74, %c1_i32_35, %c3_i32_33 : i32
    %76 = arith.remsi %73, %75 : i32
    %c0_i32_36 = arith.constant 0 : i32
    %77 = arith.cmpi ne, %76, %c0_i32_36 : i32
    %c0_i32_37 = arith.constant 0 : i32
    %78 = arith.cmpi slt, %76, %c0_i32_37 : i32
    %c0_i32_38 = arith.constant 0 : i32
    %79 = arith.cmpi slt, %75, %c0_i32_38 : i32
    %80 = arith.xori %78, %79 : i1
    %81 = arith.andi %80, %77 : i1
    %82 = arith.addi %76, %75 : i32
    %83 = arith.select %81, %82, %76 : i32
    %84 = arith.index_cast %83 : i32 to index
    %85 = memref.load %arg6[%84] : memref<3xf32, #tpu.memory_space<smem>>
    %86 = vector.broadcast %85 : f32 to vector<16x16xf32>
    %87 = arith.mulf %71, %86 : vector<16x16xf32>
    %88 = arith.index_cast %83 : i32 to index
    %89 = memref.load %arg7[%88] : memref<3xf32, #tpu.memory_space<smem>>
    %90 = vector.broadcast %89 : f32 to vector<16x16xf32>
    %91 = arith.addf %87, %90 : vector<16x16xf32>
    %92 = arith.index_cast %c1_i32_22 : i32 to index
    %c0_39 = arith.constant 0 : index
    %c0_40 = arith.constant 0 : index
    %93 = vector.load %arg8[%92, %c0_39, %c0_40] : memref<3x16x16xf32, #tpu.memory_space<vmem>>, vector<1x16x16xf32>
    %94 = vector.shape_cast %93 : vector<1x16x16xf32> to vector<16x16xf32>
    %95 = vector.shape_cast %91 : vector<16x16xf32> to vector<1x16x16xf32>
    tpu.vector_store %arg8[%92, %c0_39, %c0_40], %95 {strides = array<i32>} : memref<3x16x16xf32, #tpu.memory_space<vmem>>, vector<1x16x16xf32>,
    %c2_i32 = arith.constant 2 : i32
    %96 = arith.index_cast %c2_i32 : i32 to index
    %c0_41 = arith.constant 0 : index
    %c0_42 = arith.constant 0 : index
    %97 = vector.load %arg1[%96, %c0_41, %c0_42] : memref<3x24x20xi8, #tpu.memory_space<vmem>>, vector<1x24x20xi8>
    %98 = vector.shape_cast %97 : vector<1x24x20xi8> to vector<24x20xi8>
    %99 = arith.sitofp %98 : vector<24x20xi8> to vector<24x20xf32>
    %100 = arith.truncf %99 : vector<24x20xf32> to vector<24x20xbf16>
    %cst_43 = arith.constant dense<0.000000e+00> : vector<16x20xf32>
    %101 = tpu.matmul %0, %100, %cst_43 {dimension_numbers = #tpu.dot_dimension_numbers<[1], [0], [0], [1], [0, 0, 1, 1], [], []>} : vector<16x24xbf16>, vector<24x20xbf16>, vector<16x20xf32> -> vector<16x20xf32>
    %cst_44 = arith.constant dense<0.000000e+00> : vector<16x20xf32>
    %102 = tpu.matmul %1, %100, %cst_44 {dimension_numbers = #tpu.dot_dimension_numbers<[1], [0], [0], [1], [0, 0, 1, 1], [], []>} : vector<16x24xbf16>, vector<24x20xbf16>, vector<16x20xf32> -> vector<16x20xf32>
    %103 = arith.addf %101, %102 : vector<16x20xf32>
    %104 = arith.truncf %103 : vector<16x20xf32> to vector<16x20xbf16>
    %105 = arith.extf %104 : vector<16x20xbf16> to vector<16x20xf32>
    %106 = arith.subf %103, %105 : vector<16x20xf32>
    %107 = arith.truncf %106 : vector<16x20xf32> to vector<16x20xbf16>
    %cst_45 = arith.constant dense<0.000000e+00> : vector<16x16xf32>
    %108 = tpu.matmul %104, %2, %cst_45 {dimension_numbers = #tpu.dot_dimension_numbers<[1], [0], [0], [1], [0, 0, 1, 1], [], []>} : vector<16x20xbf16>, vector<20x16xbf16>, vector<16x16xf32> -> vector<16x16xf32>
    %cst_46 = arith.constant dense<0.000000e+00> : vector<16x16xf32>
    %109 = tpu.matmul %104, %3, %cst_46 {dimension_numbers = #tpu.dot_dimension_numbers<[1], [0], [0], [1], [0, 0, 1, 1], [], []>} : vector<16x20xbf16>, vector<20x16xbf16>, vector<16x16xf32> -> vector<16x16xf32>
    %110 = arith.addf %108, %109 : vector<16x16xf32>
    %cst_47 = arith.constant dense<0.000000e+00> : vector<16x16xf32>
    %111 = tpu.matmul %107, %2, %cst_47 {dimension_numbers = #tpu.dot_dimension_numbers<[1], [0], [0], [1], [0, 0, 1, 1], [], []>} : vector<16x20xbf16>, vector<20x16xbf16>, vector<16x16xf32> -> vector<16x16xf32>
    %112 = arith.addf %110, %111 : vector<16x16xf32>
    %113 = math.roundeven %112 : vector<16x16xf32>
    %cst_48 = arith.constant -1.280000e+02 : f32
    %cst_49 = arith.constant 1.270000e+02 : f32
    %114 = vector.broadcast %cst_48 : f32 to vector<16x16xf32>
    %115 = arith.maximumf %114, %113 : vector<16x16xf32>
    %116 = vector.broadcast %cst_49 : f32 to vector<16x16xf32>
    %117 = arith.minimumf %116, %115 : vector<16x16xf32>
    %c3_i32_50 = arith.constant 3 : i32
    %118 = arith.muli %arg0, %c3_i32_50 : i32
    %119 = arith.addi %118, %c2_i32 : i32
    %c3_i32_51 = arith.constant 3 : i32
    %c0_i32_52 = arith.constant 0 : i32
    %120 = arith.cmpi eq, %c3_i32_51, %c0_i32_52 : i32
    %c1_i32_53 = arith.constant 1 : i32
    %121 = arith.select %120, %c1_i32_53, %c3_i32_51 : i32
    %122 = arith.remsi %119, %121 : i32
    %c0_i32_54 = arith.constant 0 : i32
    %123 = arith.cmpi ne, %122, %c0_i32_54 : i32
    %c0_i32_55 = arith.constant 0 : i32
    %124 = arith.cmpi slt, %122, %c0_i32_55 : i32
    %c0_i32_56 = arith.constant 0 : i32
    %125 = arith.cmpi slt, %121, %c0_i32_56 : i32
    %126 = arith.xori %124, %125 : i1
    %127 = arith.andi %126, %123 : i1
    %128 = arith.addi %122, %121 : i32
    %129 = arith.select %127, %128, %122 : i32
    %130 = arith.index_cast %129 : i32 to index
    %131 = memref.load %arg6[%130] : memref<3xf32, #tpu.memory_space<smem>>
    %132 = vector.broadcast %131 : f32 to vector<16x16xf32>
    %133 = arith.mulf %117, %132 : vector<16x16xf32>
    %134 = arith.index_cast %129 : i32 to index
    %135 = memref.load %arg7[%134] : memref<3xf32, #tpu.memory_space<smem>>
    %136 = vector.broadcast %135 : f32 to vector<16x16xf32>
    %137 = arith.addf %133, %136 : vector<16x16xf32>
    %138 = arith.index_cast %c2_i32 : i32 to index
    %c0_57 = arith.constant 0 : index
    %c0_58 = arith.constant 0 : index
    %139 = vector.load %arg8[%138, %c0_57, %c0_58] : memref<3x16x16xf32, #tpu.memory_space<vmem>>, vector<1x16x16xf32>
    %140 = vector.shape_cast %139 : vector<1x16x16xf32> to vector<16x16xf32>
    %141 = vector.shape_cast %137 : vector<16x16xf32> to vector<1x16x16xf32>
    tpu.vector_store %arg8[%138, %c0_57, %c0_58], %141 {strides = array<i32>} : memref<3x16x16xf32, #tpu.memory_space<vmem>>, vector<1x16x16xf32>,
    %c3_i32_59 = arith.constant 3 : i32
    return
  }
  func.func @transform_0(%arg0: i32) -> (i32, i32, i32) {
    %c0_i32 = arith.constant 0 : i32
    %c0_i32_0 = arith.constant 0 : i32
    %c0_i32_1 = arith.constant 0 : i32
    return %arg0, %c0_i32, %c0_i32_0 : i32, i32, i32
  }
  func.func @transform_1(%arg0: i32) -> (i32, i32) {
    %c0_i32 = arith.constant 0 : i32
    %c0_i32_0 = arith.constant 0 : i32
    %c0_i32_1 = arith.constant 0 : i32
    return %c0_i32, %c0_i32_0 : i32, i32
  }
  func.func @transform_2(%arg0: i32) -> (i32, i32) {
    %c0_i32 = arith.constant 0 : i32
    %c0_i32_0 = arith.constant 0 : i32
    %c0_i32_1 = arith.constant 0 : i32
    return %c0_i32, %c0_i32_0 : i32, i32
  }
  func.func @transform_3(%arg0: i32) -> (i32, i32) {
    %c0_i32 = arith.constant 0 : i32
    %c0_i32_0 = arith.constant 0 : i32
    %c0_i32_1 = arith.constant 0 : i32
    return %c0_i32, %c0_i32_0 : i32, i32
  }
  func.func @transform_4(%arg0: i32) -> (i32, i32) {
    %c0_i32 = arith.constant 0 : i32
    %c0_i32_0 = arith.constant 0 : i32
    %c0_i32_1 = arith.constant 0 : i32
    return %c0_i32, %c0_i32_0 : i32, i32
  }
  func.func @transform_5(%arg0: i32) -> i32 {
    %c0_i32 = arith.constant 0 : i32
    %c0_i32_0 = arith.constant 0 : i32
    return %c0_i32 : i32
  }
  func.func @transform_6(%arg0: i32) -> i32 {
    %c0_i32 = arith.constant 0 : i32
    %c0_i32_0 = arith.constant 0 : i32
    return %c0_i32 : i32
  }
  func.func @transform_7(%arg0: i32) -> (i32, i32, i32) {
    %c0_i32 = arith.constant 0 : i32
    %c0_i32_0 = arith.constant 0 : i32
    %c0_i32_1 = arith.constant 0 : i32
    return %arg0, %c0_i32, %c0_i32_0 : i32, i32, i32
  }
}

</mosaic_0001>

<bundles_post_ra>
// kernel: tpu_custom_call.1
= control target key start
LH: loop header
LB: loop body
LE: loop exit
PB: predicated region body
PF: predicated region fallthrough
CT: control target
= control target key end

     0   :  { %12 = vsyncpa [#allocation3], 0  ;;  %s2263_s0 = inlined_call_operand.vmem [shape: s8[6,24,20], index: 0, kind: input, shape index: {}]   ;;  %s2264_s1 = inlined_call_operand.hbm [shape: bf16[16,24], index: 1, kind: input, shape index: {}]   ;;  %s2265_s2 = inlined_call_operand.hbm [shape: bf16[16,24], index: 2, kind: input, shape index: {}]   ;;  %s2266_s3 = inlined_call_operand.vmem [shape: bf16[20,16], index: 3, kind: input, shape index: {}]   ;;  %s2267_s4 = inlined_call_operand.vmem [shape: bf16[20,16], index: 4, kind: input, shape index: {}]   ;;  %s2268_s5 = inlined_call_operand.vmem [shape: f32[3], index: 5, kind: input, shape index: {}]   ;;  %s2269_s6 = inlined_call_operand.vmem [shape: f32[3], index: 6, kind: input, shape index: {}]   ;;  %s2270_s7 = inlined_call_operand.hbm [shape: f32[6,16,16], index: 7, kind: output, shape index: {}]  }
   0x1   :  { %13 = vsyncpa [#allocation7], 0 }
   0x2   :  { %14 = vsyncpa [#allocation5], 0 }
   0x3   :  { %15 = vsyncpa [#allocation10], 0 }
   0x4   :  { %16 = vsyncpa [#allocation4], 0 }
   0x5   :  { %18 = vsyncpa [#allocation4 + $0x1], 0  ;;  %s1913_s24 = smov 0   ;;  %s1915_s25 = smov 0  }
   0x6   :  { %s1917_s26 = smov 0   ;;  %s1919_s27 = smov 0  }
   0x7 LB: > { %s1934_s28 = sadd.s32 4294967295, %s1860_s27   ;;  %s1322_s29 = sadd.s32 4294967294, %s1860_s27   ;;  %s1860_s27 = sphi %s1919_s27, %s2292_s27   ;;  %s1856_s26 = sphi %s1917_s26, %s2291_s26   ;;  %s1852_s25 = sphi %s1915_s25, %s2290_s25   ;;  %s1848_s24 = sphi %s1913_s24, %s2289_s24  }
   0x8   : > { %s1938_s30 = sadd.s32 1, %s1860_s27   ;;  %s183_s8 = sadd.s32 1, %s1856_s26 }
   0x9   : > { %s180_s9 = ssub.s32 %s1860_s27, %s1938_s30  ;;  %p193_p0 = scmp.ne.s32.totalorder %s1856_s26, %s1852_s25 }
   0xa   : > { %p181_p1 = scmp.eq.s32.totalorder %s180_s9, 0  ;;  %p194_p2 = scmp.eq.s32.totalorder %s1934_s28, 1 }
   0xb   : > { %p199_p3 = scmp.ne.s32.totalorder %s1852_s25, %s1848_s24  ;;  %p200_p4 = scmp.eq.s32.totalorder %s1322_s29, 1 }
   0xc   : > { %s1949_s10 = scalar_select %p181_p1, %s1856_s26, %s183_s8  }
   0xd   : > { %p1951_p5 = por %p194_p2, %p193_p0  ;;  %p1955_p6 = por %p200_p4, %p199_p3 }
   0xe   : > { %p1323_p7 = scmp.ge.s32.totalorder %s1860_s27, 1  ;;  %p207_p8 = scmp.lt.s32.totalorder %s1860_s27, 3 }
   0xf   : > { %s2274_s11 = scalar_select %p1951_p5, 1, 0 }
  0x10   : > { %s2275_s12 = scalar_select %p1955_p6, 1, 0 }
  0x11   : > { %p2271_p9 = scmp.eq.s32.totalorder %s1934_s28, 0  ;;  %p1962_p10 = pnand %p1323_p7, %p207_p8 }
  0x12   : > { %s1862_s14 = smov [#allocation2]   ;;  %s1863_s17 = smov [#allocation6]  }
  0x13   : > { %s2276_s13 = scalar_select %p1962_p10, 1, 0 }
  0x14   : > { %s219_s15 = sshll.u32 %s1862_s14, 4  ;;  %p1621_p11 = pneg %p1962_p10  ;;  %s220_s15 = int_to_ptr.vmem [resolvable:$true] %s219_s15 }
  0x15   : > { %s232_s18 = sshll.u32 %s1863_s17, 4  ;;  %s252_s21 = sshll.u32 %s2268_s5, 4  ;;  %s233_s18 = int_to_ptr.vmem [resolvable:$true] %s232_s18  ;;  %s1977_s21 = int_to_ptr.vmem [resolvable:$true] %s252_s21 }
  0x16   : > { %p1970_p12 = pnand %p2271_p9, %p1621_p11  ;;  %s1713_s22 = scalar_lea.vmem %s220_s15, 128 }
  0x17   : > { %p1714_p0 = scmp.ne.s32.totalorder %s220_s15, %s1713_s22  ;;  %p1721_p3 = scmp.lt.s32.totalorder %s220_s15, %s220_s15 }
  0x18   : > { %p1704_p13 = pneg %p1970_p12  ;;  %p1722_p4 = scmp.lt.s32.totalorder %s1713_s22, %s1713_s22 }
  0x1a   : > { %p1716_p1 = pnand %p1714_p0, %p1704_p13  ;;  %p1723_p7 = por %p1722_p4, %p1721_p3 }
  0x1c   : > { %p1717_p2 = pneg %p1716_p1 }
  0x1e   : > { %p1724_p8 = pnand %p1723_p7, %p1717_p2 }
  0x20   : > { %1727 = shalt.err (!%p1724_p8)
}
  0x21   : > { %s1864_s23 = smov 64   ;;  %s1865_s29 = smov 4  }
  0x22   : > { %1624 = dma.hbm_to_vmem [thread:$0]  (!%p1970_p12), %s2264_s1, 128, %s220_s15, [#allocation3], %s1864_s23, %s1864_s23, %s1865_s29  }
  0x23   : > { %s1739_s14 = scalar_lea.vmem %s233_s18, 128  ;;  %p1747_p9 = scmp.lt.s32.totalorder %s233_s18, %s233_s18 }
  0x24   : > { %p1740_p11 = scmp.ne.s32.totalorder %s233_s18, %s1739_s14  ;;  %p1748_p6 = scmp.lt.s32.totalorder %s1739_s14, %s1739_s14 }
  0x26   : > { %p1742_p0 = pnand %p1740_p11, %p1704_p13  ;;  %p1749_p3 = por %p1748_p6, %p1747_p9 }
  0x28   : > { %p1743_p1 = pneg %p1742_p0 }
  0x2a   : > { %p1750_p2 = pnand %p1749_p3, %p1743_p1 }
  0x2c   : > { %1753 = shalt.err (!%p1750_p2)
}
  0x2d   : > { %1627 = dma.hbm_to_vmem [thread:$0]  (!%p1970_p12), %s2265_s2, 128, %s233_s18, [#allocation7], %s1864_s23, %s1864_s23, %s1865_s29  }
  0x2e   : > { %s263_s22 = sshll.u32 %s2269_s6, 4  ;;  %s1754_s8 = scalar_lea.vmem %s1977_s21, 16  ;;  %s264_s22 = int_to_ptr.vmem [resolvable:$true] %s263_s22 }
  0x2f   : > { %p1755_p4 = scmp.ne.s32.totalorder %s1977_s21, %s1754_s8  ;;  %p1762_p7 = scmp.lt.s32.totalorder %s1977_s21, %s1977_s21 }
  0x30   : > { %p1763_p8 = scmp.lt.s32.totalorder %s1754_s8, %s1754_s8 }
  0x31   : > { %p1757_p6 = pnand %p1755_p4, %p1704_p13 }
  0x32   : > { %p1764_p11 = por %p1763_p8, %p1762_p7 }
  0x33   : > { %p1758_p9 = pneg %p1757_p6 }
  0x35   : > { %p1765_p0 = pnand %p1764_p11, %p1758_p9 }
  0x37   : > { %1768 = shalt.err (!%p1765_p0)
}
  0x38   : > { %s1866_s9 = smov [#allocation8]   ;;  %s1769_s18 = scalar_lea.vmem %s264_s22, 16 }
  0x39   : > { %1630 = dma.vmem_to_smem (!%p1970_p12), %s1977_s21, 16, %s1866_s9, [#allocation5]  }
  0x3a   : > { %p1770_p1 = scmp.ne.s32.totalorder %s264_s22, %s1769_s18  ;;  %p1777_p4 = scmp.lt.s32.totalorder %s264_s22, %s264_s22 }
  0x3b   : > { %p1778_p6 = scmp.lt.s32.totalorder %s1769_s18, %s1769_s18 }
  0x3c   : > { %p1772_p3 = pnand %p1770_p1, %p1704_p13 }
  0x3d   : > { %p1779_p5 = por %p1778_p6, %p1777_p4 }
  0x3e   : > { %p1773_p2 = pneg %p1772_p3 }
  0x40   : > { %p1780_p10 = pnand %p1779_p5, %p1773_p2 }
  0x42   : > { %1783 = shalt.err (!%p1780_p10)
}
  0x43   : > { %s1867_s23 = smov [#allocation9]   ;;  %p2278_p9 = scmp.ne.s32.totalorder %s2276_s13, 0 }
  0x44   : > { %1633 = dma.vmem_to_smem (!%p1970_p12), %s264_s22, 16, %s1867_s23, [#allocation10]  }
  0x45   : > { %286 = sbr.rel (%p2278_p9) target bundleno = 982 (0x3d6), region = 48  ;;  %p2279_p7 = scmp.eq.s32.totalorder (!%p2278_p9), %s1934_s28, 0 }
  0x4a   : > { %1827 = dma.done.wait (%p2279_p7), [#allocation3], 128   ;;  %p2280_p8 = pmov %p2279_p7 }
  0x4b   : > { %p2281_p13 = pmov %p2279_p7 }
  0x4c   : > { %1829 = vsyncadd (%p2280_p8), [#allocation3], 4294967168 }
  0x4d   : > { %1831 = dma.done.wait (%p2281_p13), [#allocation7], 128   ;;  %p2282_p11 = pmov %p2279_p7 }
  0x4e   : > { %p2283_p5 = pmov %p2279_p7 }
  0x4f   : > { %1833 = vsyncadd (%p2282_p11), [#allocation7], 4294967168 }
  0x50   : > { %1835 = dma.done.wait (%p2283_p5), [#allocation5], 16   ;;  %p2284_p10 = pmov %p2283_p5 }
  0x51   : > { %p2285_p12 = pmov %p2283_p5 }
  0x52   : > { %1837 = vsyncadd (%p2284_p10), [#allocation5], 4294967280 }
  0x53   : > { %1839 = dma.done.wait (%p2285_p12), [#allocation10], 16   ;;  %p2286_p0 = pmov %p2283_p5 }
  0x55   : > { %1841 = vsyncadd (%p2286_p0), [#allocation10], 4294967280 }
  0x56   : > { %304 = sfence }
  0x57   : > { %s2034_s13 = smul.u32 3, %s1934_s28  ;;  %v1868_v0 = vmov 0.0   ;;  %vm1869_vm0 = vmmov 0   ;;  %vm375_vm1 = vcmask 1043456   ;;  %v2055_v10 = vld [vmem:[#allocation6] sm:$0xff]   ;;  %v2057_v11 = vld [vmem:[#allocation2] sm:$0xff]  }
  0x58   : > { %1433 = vmatprep.subr.bf16.mxu0 %v1868_v0  ;;  %1441 = vmatprep.subr.bf16.mxu1 %v1868_v0  ;;  %vm371_vm2 = vcmask 195584   ;;  %v1692_v12 = vld [vmem:[%s2267_s4 + $0x8] ss:$0 sps:$4 sm:$0x33]   ;;  %vm488_vm3 = vcmask 1041408   ;;  %v2086_v16 = vld [vmem:[%s2267_s4] sm:$0xff]  }
  0x59   : > { %p333_p1 = scmp.lt.s32.totalorder %s2034_s13, 5  ;;  %1437 = vmatprep.mubr.msk.bf16.mxu0 %vm1869_vm0, %v1868_v0  ;;  %1445 = vmatprep.mubr.msk.bf16.mxu1 %vm1869_vm0, %v1868_v0  ;;  %v1693_v13 = vld [vmem:[%s2266_s3 + $0x8] ss:$0 sps:$4 sm:$0x33]   ;;  %v2075_v14 = vsel %vm488_vm3, %v1692_v12, 0  ;;  %v2091_v17 = vld [vmem:[%s2266_s3] sm:$0xff]  }
  0x5a   : > { %v2077_v15 = vsel %vm488_vm3, %v1693_v13, 0  ;;  %vm484_vm4 = vcmask 162816   ;;  %p639_p3 = scmp.lt.s32.totalorder %s2034_s13, 0  ;;  %s329_s22 = sand.u32 1, %s1852_s25   ;;  %vm660_vm7 = vcmask 130048  }
  0x5b   : > { %s334_s16 = scalar_select %p333_p1, %s2034_s13, 5 }
  0x5c   : > { %s1553_s8 = smul.u32 48, %s329_s22  ;;  %s907_s9 = sadd.s32 1, %s2034_s13 }
  0x5d   : > { %s1554_s21 = smul.u32 6, %s334_s16  ;;  %s640_s16 = ssub.s32 0, %s2034_s13 }
  0x5e   : > { %s909_s18 = ssub.s32 0, %s907_s9  ;;  %p908_p4 = scmp.lt.s32.totalorder %s907_s9, 0 }
  0x5f   : > { %s2047_s17 = scalar_lea.vmem %s2263_s0, %s1554_s21  ;;  %s1348_s21 = smin.u32 %s640_s16, %s2034_s13 }
  0x60   : > { %v353_v1 = vld [vmem:[%s2047_s17 + $0x4] sm:$0x3]  ;;  %v351_v2 = vld [vmem:[%s2047_s17] sm:$0x3]  ;;  %v352_v3 = vld [vmem:[%s2047_s17 + $0x2] sm:$0x3]  ;;  %s1361_s23 = smin.u32 %s909_s18, %s907_s9 }
  0x61   : > { %v356_v4 = vunpack.c.l.s8.bf16 %v353_v1  ;;  %v354_v5 = vunpack.c.l.s8.bf16 %v351_v2  ;;  %v355_v6 = vunpack.c.l.s8.bf16 %v352_v3  ;;  %v1353_v18 = vld [vmem:[%s2047_s17 + $0xa] sm:$0x3]  ;;  %v1351_v25 = vld [vmem:[%s2047_s17 + $0x6] sm:$0x3]  ;;  %v1352_v26 = vld [vmem:[%s2047_s17 + $0x8] sm:$0x3] }
  0x62   : > { %v669_v19 = vunpack.c.l.s8.bf16 %v1353_v18  ;;  %v667_v33 = vunpack.c.l.s8.bf16 %v1351_v25  ;;  %v668_v34 = vunpack.c.l.s8.bf16 %v1352_v26  ;;  %1696 = sdivrem.u32 %s1348_s21, 3  ;;  %v1368_v61 = vld [vmem:[%s2047_s17 + $0x10] sm:$0x3]  ;;  %p2287_p13 = scmp.ne.s32.totalorder %s2274_s11, 0 }
  0x63   : > { %v1337_v7 = vcombine.low %v356_v4, %v356_v4  ;;  %v1336_v9 = vcombine.low %v354_v5, %v355_v6  ;;  %1698 = sdivrem.u32 %s1361_s23, 3 }
  0x64   : > { %v1355_v24 = vcombine.low %v669_v19, %v669_v19  ;;  %v1354_v39 = vcombine.low %v667_v33, %v668_v34  ;;  %v1366_v19 = vld [vmem:[%s2047_s17 + $0xc] sm:$0x3] }
  0x65   : > { %v377_v8 = vsel %vm375_vm1, %v1337_v7, 0  ;;  %v938_v7 = vunpack.c.l.s8.bf16 %v1368_v61  ;;  %v936_v33 = vunpack.c.l.s8.bf16 %v1366_v19 }
  0x66   : > { %1434 = vmatpush3.bf16.msra.mxu0 %v377_v8  ;;  %1442 = vmatpush3.bf16.msra.mxu1 %v377_v8  ;;  %v680_v36 = vsel %vm375_vm1, %v1355_v24, 0  ;;  %v1367_v24 = vld [vmem:[%s2047_s17 + $0xe] sm:$0x3]  ;;  %s2155_s17 = scalar_lea.vmem [#allocation11], %s1553_s8 }
  0x67   : > { %1435 = vmatprep.subr.bf16.mxu0 %v1868_v0  ;;  %1443 = vmatprep.subr.bf16.mxu1 %v1868_v0  ;;  %v937_v34 = vunpack.c.l.s8.bf16 %v1367_v24 }
  0x6a   : > { %1436 = vmatpush3.bf16.msra.mxu0 %v1336_v9  ;;  %1444 = vmatpush3.bf16.msra.mxu1 %v1336_v9 }
  0x6b   : > { %1449 = vmatprep.subr.bf16.mxu0 %v1868_v0  ;;  %1457 = vmatprep.subr.bf16.mxu1 %v1868_v0  ;;  %s1697_s29 = spop.drf %1696 }
  0x6c   : > { %s644_s14 = ssub.s32 0, %s1697_s29  ;;  %s1699_s16 = spop.drf %1698 }
  0x6d   : > { %1438 = vmatmul.mubr.msk.bf16.vlgmr.msra.gmra.mxu0 %vm371_vm2, %v2055_v10  ;;  %1446 = vmatmul.mubr.msk.bf16.vlgmr.msra.gmra.mxu1 %vm371_vm2, %v2057_v11  ;;  %s2294_s14 = smov (!%p639_p3, %s644_s14), %s1697_s29  ;;  %s913_s21 = ssub.s32 0, %s1699_s16 }
  0x6e   : > { %1453 = vmatprep.mubr.msk.bf16.mxu0 %vm1869_vm0, %v1868_v0  ;;  %1461 = vmatprep.mubr.msk.bf16.mxu1 %vm1869_vm0, %v1868_v0  ;;  %p1350_p2 = scmp.lt.s32.totalorder %s2294_s14, 0  ;;  %s650_s19 = sadd.s32 3, %s2294_s14 }
  0x6f   : > { %1450 = vmatpush3.bf16.msra.mxu0 %v2075_v14  ;;  %1458 = vmatpush3.bf16.msra.mxu1 %v2077_v15  ;;  %s2298_s21 = smov (!%p908_p4, %s913_s21), %s1699_s16 }
  0x70   : > { %1451 = vmatprep.subr.bf16.mxu0 %v1868_v0  ;;  %1459 = vmatprep.subr.bf16.mxu1 %v1868_v0  ;;  %s2296_s19 = smov (!%p1350_p2, %s650_s19), %s2294_s14  ;;  %p1363_p6 = scmp.lt.s32.totalorder %s2298_s21, 0 }
  0x71   : > { %s2138_s15 = sld [smem:[#allocation8 + %s2296_s19]]  ;;  %s919_s29 = sadd.s32 3, %s2298_s21 }
  0x72   : > { %s2140_s20 = sld [smem:[#allocation9 + %s2296_s19]]  ;;  %s2300_s29 = smov (!%p1363_p6, %s919_s29), %s2298_s21 }
  0x73   : > { %1452 = vmatpush3.bf16.msra.mxu0 %v2086_v16  ;;  %1460 = vmatpush3.bf16.msra.mxu1 %v2091_v17  ;;  %s2189_s14 = sld [smem:[#allocation8 + %s2300_s29]]  ;;  %s1387_s21 = smul.u32 768, %s1934_s28 }
  0x74   : > { %1465 = vmatprep.subr.bf16.mxu0 %v1868_v0  ;;  %1473 = vmatprep.subr.bf16.mxu1 %v1868_v0  ;;  %s2191_s19 = sld [smem:[#allocation9 + %s2300_s29]]  ;;  %s1216_s29 = sshll.u32 %s2155_s17, 4  ;;  %s2217_s29 = int_to_ptr.vmem [resolvable:$true] %s1216_s29 }
  0x75   : > { %s2223_s28 = scalar_lea.sflag [#allocation4], %s329_s22 }
 0x12d   : > { %v413_v20 = vpop.f32.mrf.mxu0  ;;  %v462_v21 = vpop.f32.mrf.mxu1 }
 0x12e   : > { %v463_v29 = vadd.f32 %v462_v21, %v413_v20 }
 0x12f   : > { %v1439_v22 = vpop.f32.mrf.mxu0  ;;  %v1447_v23 = vpop.f32.mrf.mxu1 }
 0x130   : > { %v1370_v23 = vcombine.low %v938_v7, %v938_v7 }
 0x131   : > { %v416_v27 = vpop.f32.mrf.mxu0  ;;  %v465_v28 = vpop.f32.mrf.mxu1 }
 0x132   : > { %v466_v30 = vadd.f32 %v465_v28, %v416_v27  ;;  %v653_v27 = vstv %s2138_s15  ;;  %s1176_s15 = sadd.s32 2, %s2034_s13 }
 0x133   : > { %v1440_v31 = vpop.f32.mrf.mxu0  ;;  %v1448_v32 = vpop.f32.mrf.mxu1  ;;  %p1177_p9 = scmp.lt.s32.totalorder %s1176_s15, 0 }
 0x134   : > { %v469_v35 = vpack.c.bf16 %v466_v30, %v463_v29 }
 0x136   : > { %v470_v37 = vunpack.c.l.bf16 %v469_v35  ;;  %v471_v38 = vunpack.c.h.bf16 %v469_v35  ;;  %1454 = vmatmul.mubr.msk.bf16.vlgmr.msra.gmra.mxu0 %vm484_vm4, %v469_v35  ;;  %1462 = vmatmul.mubr.msk.bf16.vlgmr.msra.gmra.mxu1 %vm484_vm4, %v469_v35  ;;  %v657_v35 = vstv %s2140_s20  ;;  %s1178_s20 = ssub.s32 0, %s1176_s15 }
 0x137   : > { %1466 = vmatpush3.bf16.msra.mxu0 %v2077_v15  ;;  %1474 = vmatpush3.bf16.msra.mxu1 %v680_v36  ;;  %s1376_s8 = smin.u32 %s1178_s20, %s1176_s15  ;;  %s2215_s15 = scalar_lea.hbm %s2270_s7, %s1387_s21 }
 0x138   : > { %v472_v40 = vsub.f32 %v463_v29, %v470_v37  ;;  %v473_v41 = vsub.f32 %v466_v30, %v471_v38  ;;  %1467 = vmatprep.subr.bf16.mxu0 %v1868_v0  ;;  %1475 = vmatprep.subr.bf16.mxu1 %v1868_v0  ;;  %v949_v38 = vsel %vm375_vm1, %v1370_v23, 0  ;;  %1700 = sdivrem.u32 %s1376_s8, 3  ;;  %s1784_s20 = scalar_lea.vmem %s2217_s29, 768 }
 0x139   : > { %1469 = vmatprep.mubr.msk.bf16.mxu0 %vm1869_vm0, %v1868_v0  ;;  %1477 = vmatprep.mubr.msk.bf16.mxu1 %vm1869_vm0, %v1868_v0  ;;  %p1785_p8 = scmp.ne.s32.totalorder %s2217_s29, %s1784_s20  ;;  %s1870_s8 = smov [#allocation11]  }
 0x13a   : > { %v474_v42 = vpack.c.bf16 %v473_v41, %v472_v40 }
 0x13b   : > { %1468 = vmatpush3.bf16.msra.mxu0 %v2091_v17  ;;  %1476 = vmatpush3.bf16.msra.mxu1 %v1354_v39  ;;  %p1786_p11 = pnand %p1785_p8, %p2287_p13 }
 0x13c   : > { %1481 = vmatprep.subr.bf16.mxu0 %v1868_v0  ;;  %1489 = vmatprep.subr.bf16.mxu1 %v1868_v0 }
 0x13d   : > { %p1787_p5 = pneg %p1786_p11 }
 0x13e   : > { %1470 = vmatmul.mubr.msk.bf16.vlgmr.msra.gmra.mxu0 %vm484_vm4, %v474_v42  ;;  %1478 = vmatmul.mubr.msk.bf16.vlgmr.msra.gmra.mxu1 %vm371_vm2, %v2055_v10 }
 0x13f   : > { %1482 = vmatpush3.bf16.msra.mxu0 %v680_v36  ;;  %1485 = vmatprep.mubr.msk.bf16.mxu0 %vm1869_vm0, %v1868_v0 }
 0x140   : > { %1483 = vmatprep.subr.bf16.mxu0 %v1868_v0  ;;  %1490 = vmatpush3.bf16.msra.mxu1 %v2075_v14 }
 0x141   : > { %1491 = vmatprep.subr.bf16.mxu1 %v1868_v0  ;;  %1493 = vmatprep.mubr.msk.bf16.mxu1 %vm1869_vm0, %v1868_v0  ;;  %s1701_s9 = spop.drf %1700 }
 0x142   : > { %s1182_s18 = ssub.s32 0, %s1701_s9 }
 0x143   : > { %1484 = vmatpush3.bf16.msra.mxu0 %v1354_v39  ;;  %s2302_s18 = smov (!%p1177_p9, %s1182_s18), %s1701_s9  ;;  %s1788_s9 = sshll.u32 %s1870_s8, 4  ;;  %s1789_s9 = int_to_ptr.vmem [resolvable:$false] %s1788_s9 }
 0x144   : > { %1497 = vmatprep.subr.bf16.mxu0 %v1868_v0  ;;  %1492 = vmatpush3.bf16.msra.mxu1 %v2086_v16  ;;  %p1378_p7 = scmp.lt.s32.totalorder %s2302_s18, 0  ;;  %s1188_s23 = sadd.s32 3, %s2302_s18 }
 0x145   : > { %1505 = vmatprep.subr.bf16.mxu1 %v1868_v0  ;;  %p1791_p10 = scmp.lt.s32.totalorder %s2217_s29, %s1789_s9 }
 0x146   : > { %1486 = vmatmul.mubr.msk.bf16.vlgmr.msra.gmra.mxu0 %vm371_vm2, %v2057_v11  ;;  %s2304_s23 = smov (!%p1378_p7, %s1188_s23), %s2302_s18  ;;  %s1790_s18 = scalar_lea.vmem %s1789_s9, 1536 }
 0x147   : > { %1498 = vmatpush3.bf16.msra.mxu0 %v2077_v15  ;;  %1501 = vmatprep.mubr.msk.bf16.mxu0 %vm1869_vm0, %v1868_v0  ;;  %s1190_s13 = sld [smem:[#allocation8 + %s2304_s23]]  ;;  %p1792_p12 = scmp.lt.s32.totalorder %s1790_s18, %s1784_s20 }
 0x148   : > { %1499 = vmatprep.subr.bf16.mxu0 %v1868_v0  ;;  %s1194_s16 = sld [smem:[#allocation9 + %s2304_s23]] }
 0x149   : > { %p1793_p0 = por %p1792_p12, %p1791_p10 }
 0x14b   : > { %1500 = vmatpush3.bf16.msra.mxu0 %v2091_v17  ;;  %p1794_p1 = pnand %p1793_p0, %p1787_p5 }
 0x14c   : > { %1513 = vmatprep.subr.bf16.mxu0 %v1868_v0 }
 0x1f6   : > { %v526_v43 = vpop.f32.mrf.mxu0  ;;  %v579_v44 = vpop.f32.mrf.mxu1 }
 0x1f7   : > { %v580_v51 = vadd.f32 %v579_v44, %v526_v43 }
 0x1f8   : > { %v1455_v45 = vpop.f32.mrf.mxu0  ;;  %v1463_v46 = vpop.f32.mrf.mxu1 }
 0x1f9   : > { %v1369_v45 = vcombine.low %v936_v33, %v937_v34 }
 0x1fa   : > { %v529_v47 = vpop.f32.mrf.mxu0  ;;  %v582_v48 = vpop.f32.mrf.mxu1 }
 0x1fb   : > { %v583_v57 = vadd.f32 %v582_v48, %v529_v47 }
 0x1fc   : > { %v1456_v49 = vpop.f32.mrf.mxu0  ;;  %v1464_v50 = vpop.f32.mrf.mxu1 }
 0x1fe   : > { %v623_v52 = vpop.f32.mrf.mxu0  ;;  %v716_v53 = vpop.f32.mrf.mxu1 }
 0x1ff   : > { %v630_v54 = vadd.f32 %v623_v52, %v580_v51 }
 0x200   : > { %v1471_v55 = vpop.f32.mrf.mxu0  ;;  %v1479_v56 = vpop.f32.mrf.mxu1 }
 0x201   : > { %v1557_v58 = vcvt.f32.s32 %v630_v54  ;;  %v1555_v1 = vand.u32 2147483647, %v630_v54  ;;  %v1560_v5 = vand.u32 2147483648, %v630_v54 }
 0x202   : > { %v626_v59 = vpop.f32.mrf.mxu0  ;;  %v719_v60 = vpop.f32.mrf.mxu1 }
 0x203   : > { %v1558_v62 = vcvt.s32.f32 %v1557_v58  ;;  %v631_v63 = vadd.f32 %v626_v59, %v583_v57  ;;  %vm1556_vm5 = vcmp.lt.f32.partialorder %v1555_v1, 8388608.0 }
 0x204   : > { %v1472_v2 = vpop.f32.mrf.mxu0  ;;  %v1480_v3 = vpop.f32.mrf.mxu1 }
 0x205   : > { %v1559_v4 = vand.u32 2147483647, %v1558_v62  ;;  %v1565_v6 = vcvt.f32.s32 %v631_v63  ;;  %v1563_v13 = vand.u32 2147483647, %v631_v63  ;;  %v1568_v22 = vand.u32 2147483648, %v631_v63 }
 0x206   : > { %v757_v8 = vpop.f32.mrf.mxu0 }
 0x207   : > { %v1561_v9 = vor.u32 %v1560_v5, %v1559_v4  ;;  %v1566_v12 = vcvt.s32.f32 %v1565_v6  ;;  %v758_v29 = vadd.f32 %v757_v8, %v716_v53  ;;  %vm1564_vm6 = vcmp.lt.f32.partialorder %v1563_v13, 8388608.0 }
 0x208   : > { %v1487_v18 = vpop.f32.mrf.mxu0 }
 0x209   : > { %v1562_v20 = vsel %vm1556_vm5, %v1561_v9, %v630_v54  ;;  %v1567_v21 = vand.u32 2147483647, %v1566_v12 }
 0x20a   : > { %v634_v25 = vmax.f32 %v1562_v20, -128.0  ;;  %v760_v26 = vpop.f32.mrf.mxu0 }
 0x20b   : > { %v1569_v28 = vor.u32 %v1568_v22, %v1567_v21  ;;  %v761_v30 = vadd.f32 %v760_v26, %v719_v60  ;;  %v922_v26 = vstv %s2189_s14 }
 0x20c   : > { %v636_v31 = vmin.f32 %v634_v25, 127.0  ;;  %v1488_v32 = vpop.f32.mrf.mxu0 }
 0x20d   : > { %v1570_v36 = vsel %vm1564_vm6, %v1569_v28, %v631_v63  ;;  %v764_v37 = vpack.c.bf16 %v761_v30, %v758_v29  ;;  %v926_v32 = vstv %s2191_s19 }
 0x20e   : > { %v654_v39 = vmul.f32 %v653_v27, %v636_v31  ;;  %v635_v40 = vmax.f32 %v1570_v36, -128.0 }
 0x20f   : > { %v765_v41 = vunpack.c.l.bf16 %v764_v37  ;;  %v766_v42 = vunpack.c.h.bf16 %v764_v37  ;;  %1494 = vmatmul.mubr.msk.bf16.vlgmr.msra.gmra.mxu1 %vm484_vm4, %v764_v37  ;;  %1502 = vmatmul.mubr.msk.bf16.vlgmr.msra.gmra.mxu0 %vm484_vm4, %v764_v37 }
 0x210   : > { %v658_v43 = vadd.f32 %v657_v35, %v654_v39  ;;  %v637_v44 = vmin.f32 %v635_v40, 127.0  ;;  %1506 = vmatpush3.bf16.msra.mxu1 %v2077_v15  ;;  %1514 = vmatpush3.bf16.msra.mxu0 %v949_v38 }
 0x211   : > { %v767_v46 = vsub.f32 %v758_v29, %v765_v41  ;;  %v768_v47 = vsub.f32 %v761_v30, %v766_v42  ;;  %1507 = vmatprep.subr.bf16.mxu1 %v1868_v0  ;;  %1515 = vmatprep.subr.bf16.mxu0 %v1868_v0 }
 0x212   : > { %661 = vst.msk [vmem:[%s2155_s17] sm:$0xff] %vm660_vm7, %v658_v43  ;;  %v655_v48 = vmul.f32 %v653_v27, %v637_v44  ;;  %1509 = vmatprep.mubr.msk.bf16.mxu1 %vm1869_vm0, %v1868_v0  ;;  %1517 = vmatprep.mubr.msk.bf16.mxu0 %vm1869_vm0, %v1868_v0 }
 0x213   : > { %v769_v50 = vpack.c.bf16 %v768_v47, %v767_v46 }
 0x214   : > { %v659_v49 = vadd.f32 %v657_v35, %v655_v48  ;;  %1508 = vmatpush3.bf16.msra.mxu1 %v2091_v17  ;;  %1516 = vmatpush3.bf16.msra.mxu0 %v1369_v45 }
 0x215   : > { %1521 = vmatprep.subr.bf16.mxu1 %v1868_v0  ;;  %1529 = vmatprep.subr.bf16.mxu0 %v1868_v0 }
 0x216   : > { %662 = vst.msk [vmem:[%s2155_s17 + $0x8] sm:$0xff] %vm660_vm7, %v659_v49 }
 0x217   : > { %1510 = vmatmul.mubr.msk.bf16.vlgmr.msra.gmra.mxu1 %vm484_vm4, %v769_v50  ;;  %1518 = vmatmul.mubr.msk.bf16.vlgmr.msra.gmra.mxu0 %vm371_vm2, %v2055_v10 }
 0x218   : > { %1522 = vmatpush3.bf16.msra.mxu1 %v949_v38  ;;  %1525 = vmatprep.mubr.msk.bf16.mxu1 %vm1869_vm0, %v1868_v0 }
 0x219   : > { %1523 = vmatprep.subr.bf16.mxu1 %v1868_v0  ;;  %1530 = vmatpush3.bf16.msra.mxu0 %v2075_v14 }
 0x21a   : > { %1531 = vmatprep.subr.bf16.mxu0 %v1868_v0  ;;  %1533 = vmatprep.mubr.msk.bf16.mxu0 %vm1869_vm0, %v1868_v0 }
 0x21c   : > { %1524 = vmatpush3.bf16.msra.mxu1 %v1369_v45 }
 0x21d   : > { %1537 = vmatprep.subr.bf16.mxu1 %v1868_v0  ;;  %1532 = vmatpush3.bf16.msra.mxu0 %v2086_v16 }
 0x21e   : > { %1545 = vmatprep.subr.bf16.mxu0 %v1868_v0 }
 0x21f   : > { %1526 = vmatmul.mubr.msk.bf16.vlgmr.msra.gmra.mxu1 %vm371_vm2, %v2057_v11 }
 0x220   : > { %1538 = vmatpush3.bf16.msra.mxu1 %v2077_v15  ;;  %1541 = vmatprep.mubr.msk.bf16.mxu1 %vm1869_vm0, %v1868_v0 }
 0x221   : > { %1539 = vmatprep.subr.bf16.mxu1 %v1868_v0 }
 0x224   : > { %1540 = vmatpush3.bf16.msra.mxu1 %v2091_v17 }
 0x2cf   : > { %v807_v10 = vpop.f32.mrf.mxu1  ;;  %v848_v14 = vpop.f32.mrf.mxu0 }
 0x2d0   : > { %v849_v55 = vadd.f32 %v848_v14, %v807_v10 }
 0x2d1   : > { %v1495_v11 = vpop.f32.mrf.mxu1  ;;  %v1503_v16 = vpop.f32.mrf.mxu0 }
 0x2d3   : > { %v810_v51 = vpop.f32.mrf.mxu1  ;;  %v851_v52 = vpop.f32.mrf.mxu0 }
 0x2d4   : > { %v852_v61 = vadd.f32 %v851_v52, %v810_v51 }
 0x2d5   : > { %v1496_v53 = vpop.f32.mrf.mxu1  ;;  %v1504_v54 = vpop.f32.mrf.mxu0 }
 0x2d7   : > { %v892_v56 = vpop.f32.mrf.mxu1  ;;  %v985_v57 = vpop.f32.mrf.mxu0 }
 0x2d8   : > { %v899_v58 = vadd.f32 %v892_v56, %v849_v55 }
 0x2d9   : > { %v1511_v59 = vpop.f32.mrf.mxu1  ;;  %v1519_v60 = vpop.f32.mrf.mxu0 }
 0x2da   : > { %v1573_v62 = vcvt.f32.s32 %v899_v58  ;;  %v1571_v4 = vand.u32 2147483647, %v899_v58  ;;  %v1576_v8 = vand.u32 2147483648, %v899_v58 }
 0x2db   : > { %v895_v63 = vpop.f32.mrf.mxu1  ;;  %v988_v1 = vpop.f32.mrf.mxu0 }
 0x2dc   : > { %v1574_v2 = vcvt.s32.f32 %v1573_v62  ;;  %v900_v3 = vadd.f32 %v895_v63, %v852_v61  ;;  %vm1572_vm8 = vcmp.lt.f32.partialorder %v1571_v4, 8388608.0 }
 0x2dd   : > { %v1512_v5 = vpop.f32.mrf.mxu1  ;;  %v1520_v6 = vpop.f32.mrf.mxu0 }
 0x2de   : > { %v1575_v7 = vand.u32 2147483647, %v1574_v2  ;;  %v1581_v9 = vcvt.f32.s32 %v900_v3  ;;  %v1579_v19 = vand.u32 2147483647, %v900_v3  ;;  %v1584_v23 = vand.u32 2147483648, %v900_v3 }
 0x2df   : > { %v1026_v12 = vpop.f32.mrf.mxu1  ;;  %v1191_v5 = vstv %s1190_s13 }
 0x2e0   : > { %v1577_v13 = vor.u32 %v1576_v8, %v1575_v7  ;;  %v1582_v18 = vcvt.s32.f32 %v1581_v9  ;;  %v1027_v28 = vadd.f32 %v1026_v12, %v985_v57  ;;  %vm1580_vm9 = vcmp.lt.f32.partialorder %v1579_v19, 8388608.0 }
 0x2e1   : > { %v1527_v20 = vpop.f32.mrf.mxu1  ;;  %v1195_v8 = vstv %s1194_s16 }
 0x2e2   : > { %v1578_v21 = vsel %vm1572_vm8, %v1577_v13, %v899_v58  ;;  %v1583_v22 = vand.u32 2147483647, %v1582_v18 }
 0x2e3   : > { %v903_v24 = vmax.f32 %v1578_v21, -128.0  ;;  %v1029_v25 = vpop.f32.mrf.mxu1 }
 0x2e4   : > { %v1585_v27 = vor.u32 %v1584_v23, %v1583_v22  ;;  %v1030_v29 = vadd.f32 %v1029_v25, %v988_v1 }
 0x2e5   : > { %v905_v30 = vmin.f32 %v903_v24, 127.0  ;;  %v1528_v31 = vpop.f32.mrf.mxu1 }
 0x2e6   : > { %v1586_v33 = vsel %vm1580_vm9, %v1585_v27, %v900_v3  ;;  %v1033_v34 = vpack.c.bf16 %v1030_v29, %v1027_v28 }
 0x2e7   : > { %v923_v35 = vmul.f32 %v922_v26, %v905_v30  ;;  %v904_v36 = vmax.f32 %v1586_v33, -128.0 }
 0x2e8   : > { %v1034_v37 = vunpack.c.l.bf16 %v1033_v34  ;;  %v1035_v38 = vunpack.c.h.bf16 %v1033_v34  ;;  %1534 = vmatmul.mubr.msk.bf16.vlgmr.msra.gmra.mxu0 %vm484_vm4, %v1033_v34  ;;  %1542 = vmatmul.mubr.msk.bf16.vlgmr.msra.gmra.mxu1 %vm484_vm4, %v1033_v34 }
 0x2e9   : > { %v927_v39 = vadd.f32 %v926_v32, %v923_v35  ;;  %v906_v40 = vmin.f32 %v904_v36, 127.0  ;;  %1546 = vmatpush3.bf16.msra.mxu0 %v2077_v15  ;;  %1549 = vmatprep.mubr.msk.bf16.mxu0 %vm1869_vm0, %v1868_v0 }
 0x2ea   : > { %v1036_v41 = vsub.f32 %v1027_v28, %v1034_v37  ;;  %v1037_v42 = vsub.f32 %v1030_v29, %v1035_v38  ;;  %1547 = vmatprep.subr.bf16.mxu0 %v1868_v0 }
 0x2eb   : > { %1364 = vst.msk [vmem:[%s2155_s17 + $0x10] sm:$0xff] %vm660_vm7, %v927_v39  ;;  %v924_v43 = vmul.f32 %v922_v26, %v906_v40 }
 0x2ec   : > { %v1038_v45 = vpack.c.bf16 %v1037_v42, %v1036_v41 }
 0x2ed   : > { %v928_v44 = vadd.f32 %v926_v32, %v924_v43  ;;  %1548 = vmatpush3.bf16.msra.mxu0 %v2091_v17 }
 0x2ef   : > { %1365 = vst.msk [vmem:[%s2155_s17 + $0x18] sm:$0xff] %vm660_vm7, %v928_v44 }
 0x2f0   : > { %1550 = vmatmul.mubr.msk.bf16.vlgmr.msra.gmra.mxu0 %vm484_vm4, %v1038_v45 }
 0x3a8   : > { %v1076_v15 = vpop.f32.mrf.mxu0  ;;  %v1117_v0 = vpop.f32.mrf.mxu1 }
 0x3a9   : > { %v1118_v10 = vadd.f32 %v1117_v0, %v1076_v15 }
 0x3aa   : > { %v1535_v46 = vpop.f32.mrf.mxu0  ;;  %v1543_v47 = vpop.f32.mrf.mxu1 }
 0x3ac   : > { %v1079_v48 = vpop.f32.mrf.mxu0  ;;  %v1120_v49 = vpop.f32.mrf.mxu1 }
 0x3ad   : > { %v1121_v51 = vadd.f32 %v1120_v49, %v1079_v48 }
 0x3ae   : > { %v1536_v17 = vpop.f32.mrf.mxu0  ;;  %v1544_v50 = vpop.f32.mrf.mxu1 }
 0x3b0   : > { %v1161_v14 = vpop.f32.mrf.mxu0 }
 0x3b1   : > { %v1168_v11 = vadd.f32 %v1161_v14, %v1118_v10 }
 0x3b2   : > { %v1551_v16 = vpop.f32.mrf.mxu0 }
 0x3b3   : > { %v1589_v52 = vcvt.f32.s32 %v1168_v11  ;;  %v1587_v56 = vand.u32 2147483647, %v1168_v11  ;;  %v1592_v59 = vand.u32 2147483648, %v1168_v11 }
 0x3b4   : > { %v1164_v53 = vpop.f32.mrf.mxu0 }
 0x3b5   : > { %v1590_v54 = vcvt.s32.f32 %v1589_v52  ;;  %v1169_v55 = vadd.f32 %v1164_v53, %v1121_v51  ;;  %vm1588_vm10 = vcmp.lt.f32.partialorder %v1587_v56, 8388608.0 }
 0x3b6   : > { %v1552_v57 = vpop.f32.mrf.mxu0 }
 0x3b7   : > { %v1591_v58 = vand.u32 2147483647, %v1590_v54  ;;  %v1597_v60 = vcvt.f32.s32 %v1169_v55  ;;  %v1595_v63 = vand.u32 2147483647, %v1169_v55  ;;  %v1600_v3 = vand.u32 2147483648, %v1169_v55 }
 0x3b9   : > { %v1593_v61 = vor.u32 %v1592_v59, %v1591_v58  ;;  %v1598_v62 = vcvt.s32.f32 %v1597_v60  ;;  %vm1596_vm11 = vcmp.lt.f32.partialorder %v1595_v63, 8388608.0 }
 0x3bb   : > { %v1594_v1 = vsel %vm1588_vm10, %v1593_v61, %v1168_v11  ;;  %v1599_v2 = vand.u32 2147483647, %v1598_v62 }
 0x3bc   : > { %v1172_v4 = vmax.f32 %v1594_v1, -128.0 }
 0x3bd   : > { %v1601_v6 = vor.u32 %v1600_v3, %v1599_v2 }
 0x3be   : > { %v1174_v7 = vmin.f32 %v1172_v4, 127.0 }
 0x3bf   : > { %v1602_v9 = vsel %vm1596_vm11, %v1601_v6, %v1169_v55 }
 0x3c0   : > { %v1192_v12 = vmul.f32 %v1191_v5, %v1174_v7  ;;  %v1173_v13 = vmax.f32 %v1602_v9, -128.0 }
 0x3c2   : > { %v1196_v18 = vadd.f32 %v1195_v8, %v1192_v12  ;;  %v1175_v19 = vmin.f32 %v1173_v13, 127.0 }
 0x3c4   : > { %1379 = vst.msk [vmem:[%s2155_s17 + $0x20] sm:$0xff] %vm660_vm7, %v1196_v18  ;;  %v1193_v20 = vmul.f32 %v1191_v5, %v1175_v19 }
 0x3c6   : > { %v1197_v21 = vadd.f32 %v1195_v8, %v1193_v20 }
 0x3c8   : > { %1380 = vst.msk [vmem:[%s2155_s17 + $0x28] sm:$0xff] %vm660_vm7, %v1197_v21 }
 0x3c9   : > { %1797 = shalt.err (!%p1794_p1)
}
 0x3ca   : > { %s1798_s22 = scalar_lea.hbm %s2215_s15, 768  ;;  %s1802_s13 = scalar_lea.hbm %s2270_s7, 1536 }
 0x3cb   : > { %p1799_p3 = scmp.ne.s32.totalorder %s2215_s15, %s1798_s22  ;;  %p1803_p6 = scmp.lt.s32.totalorder %s2215_s15, %s2270_s7 }
 0x3cc   : > { %p1804_p9 = scmp.lt.s32.totalorder %s1802_s13, %s1798_s22 }
 0x3cd   : > { %p1800_p2 = pnand %p1799_p3, %p2287_p13 }
 0x3ce   : > { %p1805_p7 = por %p1804_p9, %p1803_p6 }
 0x3cf   : > { %p1801_p4 = pneg %p1800_p2 }
 0x3d1   : > { %p1806_p8 = pnand %p1805_p7, %p1801_p4 }
 0x3d3   : > { %1809 = shalt.err (!%p1806_p8)
}
 0x3d4   : > { %s1871_s14 = smov 128   ;;  %s1872_s19 = smov 8  }
 0x3d5   : > { %1619 = dma.vmem_to_hbm [thread:$0]  (%p2287_p13), %s2217_s29, 768, %s2215_s15, %s2223_s28, %s1871_s14, %s1871_s14, %s1872_s19  }
 0x3d6 PF: > { %p1646_p11 = scmp.ge.s32.totalorder %s1860_s27, 2  ;;  %s1231_s20 = sand.u32 1, %s1848_s24  }
 0x3d7   : > { %p2288_p5 = scmp.ne.s32.totalorder %s2275_s12, 0  ;;  %s1232_s8 = scalar_lea.sflag [#allocation4], %s1231_s20 }
 0x3d9   : > { %p1635_p10 = pnand %p1646_p11, %p2288_p5 }
 0x3db   : > { %p1636_p12 = pneg %p1635_p10 }
 0x3dd   : > { %1843 = dma.done.wait (%p1636_p12), %s1232_s8, 768  }
 0x3de   : > { %1845 = vsyncadd (%p1636_p12), %s1232_s8, 4294966528  ;;  %p21_p0 = scmp.ge.s32.totalorder %s1938_s30, 4   ;;  %s2289_s24 = smov %s1852_s25 }
 0x3df   : > { %s2290_s25 = smov %s1856_s26  ;;  %s2291_s26 = smov %s1949_s10 }
 0x3e0   : > { %s2292_s27 = smov %s1938_s30  ;;  %23 = sbr.rel (!%p21_p0) target bundleno = 7 (0x7), region = 105 }
 0x3e5   :  { %1237 = vsyncpa [#allocation3], 1 }
 0x3e6   :  { %1239 = vsyncpa [#allocation3 + $0x1], 1 }
 0x3e7   :  { %1240 = vsyncpa [#allocation7], 1 }
 0x3e8   :  { %1241 = vsyncpa [#allocation4], 1 }
 0x3e9   :  { %1243 = vsyncpa [#allocation4 + $0x1], 1 }
 0x3ea   :  { %1244 = vsyncpa [#allocation5], 1 }
 0x3eb   :  { %1246 = vsyncpa [#allocation5 + $0x1], 1 }
 0x3ec   :  { %1247 = vsyncpa [#allocation10], 1 }

</bundles_post_ra>
